<compile_context>
chip_gen: v7x
topology: tpu7x:2x2x1
jax: 0.10.0
libtpu: 0.0.40
codegen_flags: <defaults>
</compile_context>

<pallas_src>
import jax
import jax.numpy as jnp
import numpy as np
from jax.experimental import pallas as pl
from jax.experimental.pallas import tpu as pltpu


# ---- packed-parameter slab layouts ------------------------------------------------
# wslab: bf16, 128 lanes, every section starts on a 16-sublane boundary.
_ROW_WG1 = 0          # GCNConv1 weight, zero-padded (64, 64) -> (64, 128)
_ROW_WGCN2 = 64       # fused GCN tail weight  Wg2 @ GCN.fc @ tail_g, tiled + row-padded (128, 128)
_ROW_W2EMB = 192      # fused emb tail weight  W2 @ tail_e, tiled (1024, 128)
_WSLAB_ROWS = 192 + 1024
# bslab: f32, 128 lanes, every section starts on an 8-sublane boundary.
_ROW_BG1 = 0          # GCNConv1 bias, zero-padded 64 -> 128
_ROW_BF = 8           # fully fused output bias, tiled across 128 lanes
_BSLAB_ROWS = 16


def combined_sparse_kernel(x_emb_ref, phat_ref, a_hat_ref, x_nodes_ref,
                           w1_ref, wslab_ref, bslab_ref, out_ref, x1_ref):
    f32, bf16 = jnp.float32, jnp.bfloat16

    # Node-level GCN layer 1 is batch-independent: compute once (first grid step)
    # into VMEM scratch and reuse it for every batch tile.
    @pl.when(pl.program_id(0) == 0)
    def _():
        wg1 = wslab_ref[_ROW_WG1:_ROW_WG1 + 64, :]                         # bf16 (64, 128)
        bg1 = bslab_ref[_ROW_BG1:_ROW_BG1 + 1, :]                          # f32  (1, 128)
        xw1 = jnp.dot(x_nodes_ref[...], wg1, preferred_element_type=f32)   # (N, 128)
        x1_ref[...] = jnp.maximum(
            jnp.dot(a_hat_ref[...], xw1.astype(bf16), preferred_element_type=f32) + bg1,
            0.0)

    w2emb = wslab_ref[_ROW_W2EMB:_ROW_W2EMB + 1024, :]                     # bf16 (1024, 128)
    wgcn2 = wslab_ref[_ROW_WGCN2:_ROW_WGCN2 + 128, :]                      # bf16 (128, 128)
    b_f = bslab_ref[_ROW_BF:_ROW_BF + 1, :]                                # f32  (1, 128)

    # Embedding branch: h = relu(x_aug @ W1_aug) (b1 folded via ones column); the
    # whole linear tail fc2 -> attention(V@Wo at seq=1) -> fc1 -> fc_final is w2emb.
    h = jnp.maximum(jnp.dot(x_emb_ref[...], w1_ref[...], preferred_element_type=f32), 0.0)
    emb_c = jnp.dot(h.astype(bf16), w2emb, preferred_element_type=f32)     # (TB, 128)

    # GCN branch, reordered through the mean pool: (P @ A_hat) @ x1 @ (Wg2 @ fc @ tail_g).
    pooled1 = jnp.dot(phat_ref[...], x1_ref[...].astype(bf16), preferred_element_type=f32)
    gcn_c = jnp.dot(pooled1.astype(bf16), wgcn2, preferred_element_type=f32)

    # Lane-dense output: every lane carries the same fused scalar (wrapper takes lane 0).
    # TODO(synk): at large B, transpose each 128-row block on the XLU and store a
    #             compact output instead of this 128x-redundant slab.
    out_ref[...] = emb_c + gcn_c + b_f


def combined_sparse_forward(x_emb, a_hat, x_nodes, pool, fused_params):
    w1_aug, wslab, bslab = fused_params
    B = x_emb.shape[0]
    N = a_hat.shape[0]
    Ea = w1_aug.shape[0]
    bf16 = jnp.bfloat16

    # Fold b1 into the first matmul via a ones column; zero-pad to W1_aug's row count.
    x_aug = jnp.concatenate([x_emb, jnp.ones((B, 1), x_emb.dtype)], axis=1)
    x_aug = jnp.pad(x_aug, ((0, 0), (0, Ea - x_aug.shape[1])))
    # Reorder GCN layer-2 aggregation through the (data-independent) mean pool.
    p_hat = pool @ a_hat                                                   # (B, N)

    # Batch tiling: one tile for small B, 256-row (8-sublane aligned) tiles otherwise.
    if B <= 256:
        tb, b_pad = B, B
    else:
        tb = 256
        b_pad = ((B + tb - 1) // tb) * tb
        x_aug = jnp.pad(x_aug, ((0, b_pad - B), (0, 0)))
        p_hat = jnp.pad(p_hat, ((0, b_pad - B), (0, 0)))

    inputs = (x_aug.astype(bf16), p_hat.astype(bf16), a_hat.astype(bf16),
              x_nodes.astype(bf16), w1_aug, wslab, bslab)

    out128 = pl.pallas_call(
        combined_sparse_kernel,
        out_shape=jax.ShapeDtypeStruct((b_pad, 128), jnp.float32),
        grid_spec=pltpu.PrefetchScalarGridSpec(
            num_scalar_prefetch=0,
            grid=(b_pad // tb,),
            in_specs=[
                pl.BlockSpec((tb, Ea), lambda i: (i, 0)),                  # x_aug: blocked over B
                pl.BlockSpec((tb, N), lambda i: (i, 0)),                   # p_hat: blocked over B
                pl.BlockSpec((N, N), lambda i: (0, 0)),                    # a_hat: VMEM-resident
                pl.BlockSpec((N, x_nodes.shape[1]), lambda i: (0, 0)),     # node features
                pl.BlockSpec((Ea, 1024), lambda i: (0, 0)),                # W1 (+ b1 row)
                pl.BlockSpec((_WSLAB_ROWS, 128), lambda i: (0, 0)),        # bf16 weight slab
                pl.BlockSpec((_BSLAB_ROWS, 128), lambda i: (0, 0)),        # f32 bias slab
            ],
            out_specs=pl.BlockSpec((tb, 128), lambda i: (i, 0)),
            scratch_shapes=[pltpu.VMEM((N, 128), jnp.float32)],            # cached GCN layer-1
        ),
        compiler_params=pltpu.CompilerParams(
            # "arbitrary": the x1 scratch is filled at step 0 and reused by later B tiles.
            # TODO(synk): for v7x core-parallelism, recompute x1 per core (or hoist the
            #             node-level GCN into its own call) and mark this axis 'parallel'.
            dimension_semantics=("arbitrary",),
            # Explicit limit keeps v5e (16 MiB scoped default) behaving like v6e/v7x.
            vmem_limit_bytes=32 * 1024 * 1024,
            # TODO(synk): for N beyond a few thousand, a_hat no longer fits VMEM; switch
            #             a_hat/x_nodes to memory_space=pl.ANY + manual DMA of node-row
            #             blocks (or exploit the block-diagonal per-graph structure via
            #             PrefetchScalarGridSpec row offsets).
        ),
    )(*inputs)
    # Every lane of the output slab carries the same fused scalar; take lane 0.
    return out128[:B, :1]


def make_params(key, embedding_dim, hidden_dim=64):
    """Deterministic synthetic parameters; shapes follow the PyTorch module."""
    def lin(k, fan_in, fan_out):
        kw, kb = jax.random.split(k)
        w = jax.random.normal(kw, (fan_in, fan_out), jnp.float32) * 0.05
        b = jax.random.normal(kb, (1, fan_out), jnp.float32) * 0.05
        return w, b

    ks = jax.random.split(key, 11)
    p = {}
    p["w1"], p["b1"] = lin(ks[0], embedding_dim, 1024)             # EmbeddingDNN.fc1
    p["w2"], p["b2"] = lin(ks[1], 1024, hidden_dim)                # EmbeddingDNN.fc2
    p["wg1"], p["bg1"] = lin(ks[2], 64, 64)                        # GCNConv(64, 64)
    p["wg2"], p["bg2"] = lin(ks[3], 64, 128)                       # GCNConv(64, 128)
    p["wgfc"], p["bgfc"] = lin(ks[4], 128, hidden_dim)             # GCN.fc
    p["wq"], p["bq"] = lin(ks[5], 2 * hidden_dim, 2 * hidden_dim)  # SparseAttention.query (unused at seq=1)
    p["wk"], p["bk"] = lin(ks[6], 2 * hidden_dim, 2 * hidden_dim)  # SparseAttention.key   (unused at seq=1)
    p["wv"], p["bv"] = lin(ks[7], 2 * hidden_dim, 2 * hidden_dim)  # SparseAttention.value
    p["wo"], p["bo"] = lin(ks[8], 2 * hidden_dim, 2 * hidden_dim)  # SparseAttention.out
    p["wfc1"], p["bfc1"] = lin(ks[9], 2 * hidden_dim, hidden_dim)  # fc1
    p["wff"], p["bff"] = lin(ks[10], hidden_dim, 1)                # fc_final
    return p


def fuse_and_pack_params(p, hidden_dim=64):
    """Fold every purely-linear op after the two ReLUs into two fused weights + one
    bias, and pack all 128-lane parameters into two tile-aligned slabs."""
    assert hidden_dim == 64, "slab layout assumes hidden_dim == 64 (embed_dim == 128)"
    L = 128
    # seq_len == 1 => the top-k sparse attention output == V, so the whole tail
    # value -> out -> fc1 -> fc_final is one affine map (dropout = eval identity).
    tail = p["wv"] @ p["wo"] @ p["wfc1"] @ p["wff"]                                  # (128, 1)
    b_tail = ((p["bv"] @ p["wo"] + p["bo"]) @ p["wfc1"] + p["bfc1"]) @ p["wff"] + p["bff"]
    tail_e, tail_g = tail[:hidden_dim], tail[hidden_dim:]

    w2emb = p["w2"] @ tail_e                       # (1024, 1)  EmbeddingDNN.fc2 folded
    u = p["wgfc"] @ tail_g                         # (128, 1)   GCN.fc folded
    wgcn2 = p["wg2"] @ u                           # (64, 1)    GCNConv2 weight folded
    # mean-pool rows sum to 1, so bg2 folds exactly through the pooling reorder
    b_f = p["b2"] @ tail_e + p["bgfc"] @ tail_g + p["bg2"] @ u + b_tail              # (1, 1)

    # Tile the 1-wide fused weights/bias across 128 lanes (lane-dense output); all
    # lanes must stay bit-identical for the wrapper's lane-0 slice to be valid.
    w2emb_t = jnp.tile(w2emb, (1, L))                                     # (1024, 128)
    wgcn2_t = jnp.pad(jnp.tile(wgcn2, (1, L)), ((0, L - 64), (0, 0)))     # (128, 128)
    b_f_t = jnp.tile(b_f, (1, L))                                         # (1, 128)

    # Zero-pad GCN layer-1 params to 128 lanes (x1 / pooled1 stay lane-dense; the
    # padded columns are exactly zero and hit the zero rows of wgcn2_t).
    wg1_p = jnp.pad(p["wg1"], ((0, 0), (0, L - 64)))                      # (64, 128)
    bg1_p = jnp.pad(p["bg1"], ((0, 0), (0, L - 64)))                      # (1, 128)

    wslab = jnp.concatenate([wg1_p, wgcn2_t, w2emb_t], axis=0).astype(jnp.bfloat16)
    assert wslab.shape == (_WSLAB_ROWS, L)

    def pad_rows(x, rows):
        return jnp.pad(x, ((0, rows - x.shape[0]), (0, 0)))

    bslab = jnp.concatenate([pad_rows(bg1_p, 8), pad_rows(b_f_t, 8)], axis=0).astype(jnp.float32)
    assert bslab.shape == (_BSLAB_ROWS, L)

    # Fold b1 into W1 via a trailing ones column on the input; zero-pad rows to a
    # 16-sublane multiple (the matching input columns are zero too -> exact).
    ea = p["w1"].shape[0] + 1
    ea_pad = ((ea + 15) // 16) * 16
    w1_aug = jnp.concatenate([p["w1"], p["b1"]], axis=0)
    w1_aug = jnp.pad(w1_aug, ((0, ea_pad - ea), (0, 0))).astype(jnp.bfloat16)
    return w1_aug, wslab, bslab


def reference_forward(x_emb, a_hat, x_nodes, pool, p):
    """Pure-JAX, un-fused f32 reference following the PyTorch module (eval mode)."""
    h = jnp.maximum(x_emb @ p["w1"] + p["b1"], 0.0)
    emb = h @ p["w2"] + p["b2"]                                       # (B, 64)
    x1 = jnp.maximum(a_hat @ (x_nodes @ p["wg1"]) + p["bg1"], 0.0)
    x2 = a_hat @ (x1 @ p["wg2"]) + p["bg2"]
    pooled = pool @ x2
    gcn = pooled @ p["wgfc"] + p["bgfc"]                              # (B, 64)
    c = jnp.concatenate([emb, gcn], axis=-1)[:, None, :]              # (B, 1, 128)

    B, S, E = c.shape
    H, Dh = 4, E // 4

    def proj(w, b):
        return (c.reshape(B * S, E) @ w + b).reshape(B, S, H, Dh).transpose(0, 2, 1, 3)

    Q, K, V = proj(p["wq"], p["bq"]), proj(p["wk"], p["bk"]), proj(p["wv"], p["bv"])
    scores = jnp.einsum("bhqd,bhkd->bhqk", Q, K) / jnp.sqrt(jnp.float32(Dh))
    k = min(5, S)
    _, idx = jax.lax.top_k(scores, k)
    mask = jax.nn.one_hot(idx, S, dtype=scores.dtype).sum(axis=-2)    # (B, H, S, S)
    attn_w = jax.nn.softmax(scores * mask, axis=-1)
    out = jnp.einsum("bhqk,bhkd->bhqd", attn_w, V)
    out = out.transpose(0, 2, 1, 3).reshape(B, S, E)
    out = (out.reshape(B * S, E) @ p["wo"] + p["bo"]).reshape(B, E)
    h2 = out @ p["wfc1"] + p["bfc1"]
    return h2 @ p["wff"] + p["bff"]


def build_graph(num_nodes, edges, batch_ids, num_graphs):
    """Dense GCN normalization + mean-pool matrix (host glue, matches PyG GCNConv).
    # TODO(synk): edge_index -> dense A_hat / pool matrix stays host-side; the
    #             scatter-based sparse aggregation has no clean Pallas form at this scale."""
    A = np.zeros((num_nodes, num_nodes), np.float32)
    for s, d in edges:
        A[s, d] = 1.0
        A[d, s] = 1.0
    A_tilde = A + np.eye(num_nodes, dtype=np.float32)
    deg = A_tilde.sum(axis=1)
    d_inv_sqrt = 1.0 / np.sqrt(deg)
    a_hat = (d_inv_sqrt[:, None] * A_tilde) * d_inv_sqrt[None, :]

    pool = np.zeros((num_graphs, num_nodes), np.float32)
    counts = np.bincount(batch_ids, minlength=num_graphs)
    for n, b in enumerate(batch_ids):
        pool[b, n] = 1.0 / counts[b]
    return jnp.asarray(a_hat), jnp.asarray(pool)


if __name__ == "__main__":
    B = 2                 # batch (number of graphs / smiles embeddings)
    E = 32                # embedding_dim
    HIDDEN = 64
    N = 8                 # total graph nodes (4 per graph)

    key = jax.random.PRNGKey(0)
    k_in, k_nodes, k_par = jax.random.split(key, 3)

    # smiles_embedding is (B, 1, E) in the torch model; the size-1 seq dim is
    # squeezed by the forward, so the kernel consumes (B, E).
    smiles_embedding = jax.random.normal(k_in, (B, 1, E), jnp.float32)
    x_emb = smiles_embedding.reshape(B, E)

    # Graph: node features (N, 64), chain edges within each 4-node graph.
    x_nodes = jax.random.normal(k_nodes, (N, 64), jnp.float32)
    edges = [(0, 1), (1, 2), (2, 3), (4, 5), (5, 6), (6, 7)]
    batch_ids = [0, 0, 0, 0, 1, 1, 1, 1]
    a_hat, pool = build_graph(N, edges, batch_ids, B)

    params = make_params(k_par, E, HIDDEN)
    fused = fuse_and_pack_params(params, HIDDEN)

    out = combined_sparse_forward(x_emb, a_hat, x_nodes, pool, fused)
    out = jax.block_until_ready(out)

    ref = jax.block_until_ready(reference_forward(x_emb, a_hat, x_nodes, pool, params))
    assert out.shape == (B, 1) and bool(jnp.all(jnp.isfinite(out)))
    # bf16 MXU operands with f32 accumulation -> loosened tolerance vs the f32 reference.
    assert bool(jnp.allclose(out, ref, rtol=2e-2, atol=2e-3)), (out, ref)
    print("KERNEL_OK")
</pallas_src>

<mosaic_0001>
module attributes {stable_mosaic.version = 11 : i64} {
  func.func @combined_sparse_kernel(%arg0: i32, %arg1: memref<2x48xbf16, #tpu.memory_space<vmem>>, %arg2: memref<2x8xbf16, #tpu.memory_space<vmem>>, %arg3: memref<8x8xbf16, #tpu.memory_space<vmem>>, %arg4: memref<8x64xbf16, #tpu.memory_space<vmem>>, %arg5: memref<48x1024xbf16, #tpu.memory_space<vmem>>, %arg6: memref<1216x128xbf16, #tpu.memory_space<vmem>>, %arg7: memref<16x128xf32, #tpu.memory_space<vmem>>, %arg8: memref<2x128xf32, #tpu.memory_space<vmem>>, %arg9: memref<8x128xf32, #tpu.memory_space<vmem>>) attributes {dimension_semantics = [#tpu.dimension_semantics<arbitrary>], iteration_bounds = array<i64: 1>, scalar_prefetch = 0 : i64, scratch_operands = 1 : i64, tpu.core_type = #tpu.core_type<tc>, window_params = [{transform_indices = @transform_0, window_bounds = array<i64: 2, 48>}, {transform_indices = @transform_1, window_bounds = array<i64: 2, 8>}, {pipeline_mode = #tpu.pipeline_mode<synchronous>, transform_indices = @transform_2, window_bounds = array<i64: 8, 8>}, {pipeline_mode = #tpu.pipeline_mode<synchronous>, transform_indices = @transform_3, window_bounds = array<i64: 8, 64>}, {pipeline_mode = #tpu.pipeline_mode<synchronous>, transform_indices = @transform_4, window_bounds = array<i64: 48, 1024>}, {pipeline_mode = #tpu.pipeline_mode<synchronous>, transform_indices = @transform_5, window_bounds = array<i64: 1216, 128>}, {pipeline_mode = #tpu.pipeline_mode<synchronous>, transform_indices = @transform_6, window_bounds = array<i64: 16, 128>}, {transform_indices = @transform_7, window_bounds = array<i64: 2, 128>}]} {
    %c0_i32 = arith.constant 0 : i32
    %0 = arith.cmpi eq, %arg0, %c0_i32 : i32
    %1 = arith.extui %0 : i1 to i32
    %c0_i32_0 = arith.constant 0 : i32
    %2 = arith.cmpi ne, %1, %c0_i32_0 : i32
    scf.if %2 {
      %c0_17 = arith.constant 0 : index
      %c0_18 = arith.constant 0 : index
      %23 = vector.load %arg6[%c0_17, %c0_18] : memref<1216x128xbf16, #tpu.memory_space<vmem>>, vector<64x128xbf16>
      %c0_19 = arith.constant 0 : index
      %c0_20 = arith.constant 0 : index
      %24 = vector.load %arg7[%c0_19, %c0_20] : memref<16x128xf32, #tpu.memory_space<vmem>>, vector<1x128xf32>
      %c0_21 = arith.constant 0 : index
      %c0_22 = arith.constant 0 : index
      %25 = vector.load %arg4[%c0_21, %c0_22] : memref<8x64xbf16, #tpu.memory_space<vmem>>, vector<8x64xbf16>
      %cst_23 = arith.constant dense<0.000000e+00> : vector<8x128xf32>
      %26 = tpu.matmul %25, %23, %cst_23 {dimension_numbers = #tpu.dot_dimension_numbers<[1], [0], [0], [1], [0, 0, 1, 1], [], []>} : vector<8x64xbf16>, vector<64x128xbf16>, vector<8x128xf32> -> vector<8x128xf32>
      %c0_24 = arith.constant 0 : index
      %c0_25 = arith.constant 0 : index
      %27 = vector.load %arg3[%c0_24, %c0_25] : memref<8x8xbf16, #tpu.memory_space<vmem>>, vector<8x8xbf16>
      %28 = arith.truncf %26 : vector<8x128xf32> to vector<8x128xbf16>
      %cst_26 = arith.constant dense<0.000000e+00> : vector<8x128xf32>
      %29 = tpu.matmul %27, %28, %cst_26 {dimension_numbers = #tpu.dot_dimension_numbers<[1], [0], [0], [1], [0, 0, 1, 1], [], []>} : vector<8x8xbf16>, vector<8x128xbf16>, vector<8x128xf32> -> vector<8x128xf32>
      %30 = vector.broadcast %24 : vector<1x128xf32> to vector<8x128xf32>
      %31 = arith.addf %29, %30 : vector<8x128xf32>
      %cst_27 = arith.constant 0.000000e+00 : f32
      %32 = vector.broadcast %cst_27 : f32 to vector<8x128xf32>
      %33 = arith.maximumf %31, %32 : vector<8x128xf32>
      %c0_28 = arith.constant 0 : index
      %c0_29 = arith.constant 0 : index
      %34 = vector.load %arg9[%c0_28, %c0_29] : memref<8x128xf32, #tpu.memory_space<vmem>>, vector<8x128xf32>
      tpu.vector_store %arg9[%c0_28, %c0_29], %33 {strides = array<i32>} : memref<8x128xf32, #tpu.memory_space<vmem>>, vector<8x128xf32>,
    } else {
    }
    %c192 = arith.constant 192 : index
    %c0 = arith.constant 0 : index
    %3 = vector.load %arg6[%c192, %c0] : memref<1216x128xbf16, #tpu.memory_space<vmem>>, vector<1024x128xbf16>
    %c64 = arith.constant 64 : index
    %c0_1 = arith.constant 0 : index
    %4 = vector.load %arg6[%c64, %c0_1] : memref<1216x128xbf16, #tpu.memory_space<vmem>>, vector<128x128xbf16>
    %c8 = arith.constant 8 : index
    %c0_2 = arith.constant 0 : index
    %5 = vector.load %arg7[%c8, %c0_2] : memref<16x128xf32, #tpu.memory_space<vmem>>, vector<1x128xf32>
    %c0_3 = arith.constant 0 : index
    %c0_4 = arith.constant 0 : index
    %6 = vector.load %arg1[%c0_3, %c0_4] : memref<2x48xbf16, #tpu.memory_space<vmem>>, vector<2x48xbf16>
    %c0_5 = arith.constant 0 : index
    %c0_6 = arith.constant 0 : index
    %7 = vector.load %arg5[%c0_5, %c0_6] : memref<48x1024xbf16, #tpu.memory_space<vmem>>, vector<48x1024xbf16>
    %cst = arith.constant dense<0.000000e+00> : vector<2x1024xf32>
    %8 = tpu.matmul %6, %7, %cst {dimension_numbers = #tpu.dot_dimension_numbers<[1], [0], [0], [1], [0, 0, 1, 1], [], []>} : vector<2x48xbf16>, vector<48x1024xbf16>, vector<2x1024xf32> -> vector<2x1024xf32>
    %cst_7 = arith.constant 0.000000e+00 : f32
    %9 = vector.broadcast %cst_7 : f32 to vector<2x1024xf32>
    %10 = arith.maximumf %8, %9 : vector<2x1024xf32>
    %11 = arith.truncf %10 : vector<2x1024xf32> to vector<2x1024xbf16>
    %cst_8 = arith.constant dense<0.000000e+00> : vector<2x128xf32>
    %12 = tpu.matmul %11, %3, %cst_8 {dimension_numbers = #tpu.dot_dimension_numbers<[1], [0], [0], [1], [0, 0, 1, 1], [], []>} : vector<2x1024xbf16>, vector<1024x128xbf16>, vector<2x128xf32> -> vector<2x128xf32>
    %c0_9 = arith.constant 0 : index
    %c0_10 = arith.constant 0 : index
    %13 = vector.load %arg2[%c0_9, %c0_10] : memref<2x8xbf16, #tpu.memory_space<vmem>>, vector<2x8xbf16>
    %c0_11 = arith.constant 0 : index
    %c0_12 = arith.constant 0 : index
    %14 = vector.load %arg9[%c0_11, %c0_12] : memref<8x128xf32, #tpu.memory_space<vmem>>, vector<8x128xf32>
    %15 = arith.truncf %14 : vector<8x128xf32> to vector<8x128xbf16>
    %cst_13 = arith.constant dense<0.000000e+00> : vector<2x128xf32>
    %16 = tpu.matmul %13, %15, %cst_13 {dimension_numbers = #tpu.dot_dimension_numbers<[1], [0], [0], [1], [0, 0, 1, 1], [], []>} : vector<2x8xbf16>, vector<8x128xbf16>, vector<2x128xf32> -> vector<2x128xf32>
    %17 = arith.truncf %16 : vector<2x128xf32> to vector<2x128xbf16>
    %cst_14 = arith.constant dense<0.000000e+00> : vector<2x128xf32>
    %18 = tpu.matmul %17, %4, %cst_14 {dimension_numbers = #tpu.dot_dimension_numbers<[1], [0], [0], [1], [0, 0, 1, 1], [], []>} : vector<2x128xbf16>, vector<128x128xbf16>, vector<2x128xf32> -> vector<2x128xf32>
    %19 = arith.addf %12, %18 : vector<2x128xf32>
    %20 = vector.broadcast %5 : vector<1x128xf32> to vector<2x128xf32>
    %21 = arith.addf %19, %20 : vector<2x128xf32>
    %c0_15 = arith.constant 0 : index
    %c0_16 = arith.constant 0 : index
    %22 = vector.load %arg8[%c0_15, %c0_16] : memref<2x128xf32, #tpu.memory_space<vmem>>, vector<2x128xf32>
    tpu.vector_store %arg8[%c0_15, %c0_16], %21 {strides = array<i32>} : memref<2x128xf32, #tpu.memory_space<vmem>>, vector<2x128xf32>,
    return
  }
  func.func @transform_0(%arg0: i32) -> (i32, i32) {
    %c0_i32 = arith.constant 0 : i32
    %c0_i32_0 = arith.constant 0 : i32
    return %arg0, %c0_i32 : i32, i32
  }
  func.func @transform_1(%arg0: i32) -> (i32, i32) {
    %c0_i32 = arith.constant 0 : i32
    %c0_i32_0 = arith.constant 0 : i32
    return %arg0, %c0_i32 : i32, i32
  }
  func.func @transform_2(%arg0: i32) -> (i32, i32) {
    %c0_i32 = arith.constant 0 : i32
    %c0_i32_0 = arith.constant 0 : i32
    %c0_i32_1 = arith.constant 0 : i32
    return %c0_i32, %c0_i32_0 : i32, i32
  }
  func.func @transform_3(%arg0: i32) -> (i32, i32) {
    %c0_i32 = arith.constant 0 : i32
    %c0_i32_0 = arith.constant 0 : i32
    %c0_i32_1 = arith.constant 0 : i32
    return %c0_i32, %c0_i32_0 : i32, i32
  }
  func.func @transform_4(%arg0: i32) -> (i32, i32) {
    %c0_i32 = arith.constant 0 : i32
    %c0_i32_0 = arith.constant 0 : i32
    %c0_i32_1 = arith.constant 0 : i32
    return %c0_i32, %c0_i32_0 : i32, i32
  }
  func.func @transform_5(%arg0: i32) -> (i32, i32) {
    %c0_i32 = arith.constant 0 : i32
    %c0_i32_0 = arith.constant 0 : i32
    %c0_i32_1 = arith.constant 0 : i32
    return %c0_i32, %c0_i32_0 : i32, i32
  }
  func.func @transform_6(%arg0: i32) -> (i32, i32) {
    %c0_i32 = arith.constant 0 : i32
    %c0_i32_0 = arith.constant 0 : i32
    %c0_i32_1 = arith.constant 0 : i32
    return %c0_i32, %c0_i32_0 : i32, i32
  }
  func.func @transform_7(%arg0: i32) -> (i32, i32) {
    %c0_i32 = arith.constant 0 : i32
    %c0_i32_0 = arith.constant 0 : i32
    return %arg0, %c0_i32 : i32, i32
  }
}

</mosaic_0001>

<bundles_post_ra>
// kernel: tpu_custom_call.1
= control target key start
LH: loop header
LB: loop body
LE: loop exit
PB: predicated region body
PF: predicated region fallthrough
CT: control target
= control target key end

     0   :  { %12 = vsyncpa [#allocation4], 0  ;;  %s2039_s0 = inlined_call_operand.hbm [shape: bf16[2,48], index: 0, kind: input, shape index: {}]   ;;  %s2040_s1 = inlined_call_operand.vmem [shape: bf16[2,8], index: 1, kind: input, shape index: {}]   ;;  %s2041_s2 = inlined_call_operand.vmem [shape: bf16[8,8], index: 2, kind: input, shape index: {}]   ;;  %s2042_s3 = inlined_call_operand.hbm [shape: bf16[8,64], index: 3, kind: input, shape index: {}]   ;;  %s2043_s4 = inlined_call_operand.hbm [shape: bf16[48,1024], index: 4, kind: input, shape index: {}]   ;;  %s2044_s5 = inlined_call_operand.hbm [shape: bf16[1216,128], index: 5, kind: input, shape index: {}]   ;;  %s2045_s6 = inlined_call_operand.vmem [shape: f32[16,128], index: 6, kind: input, shape index: {}]   ;;  %s2046_s7 = inlined_call_operand.hbm [shape: f32[2,128], index: 7, kind: output, shape index: {}]  }
   0x1   :  { %13 = vsyncpa [#allocation7], 0 }
   0x2   :  { %14 = vsyncpa [#allocation10], 0 }
   0x3   :  { %15 = vsyncpa [#allocation5], 0  ;;  %s1863_s24 = smov [#allocation6]   ;;  %s1864_s26 = smov [#allocation3]  }
   0x4   :  { %s36_s25 = sshll.u32 %s1863_s24, 4  ;;  %s22_s27 = sshll.u32 %s1864_s26, 4  ;;  %s37_s25 = int_to_ptr.vmem [resolvable:$true] %s36_s25  ;;  %s23_s27 = int_to_ptr.vmem [resolvable:$true] %s22_s27 }
   0x5   :  { %s1745_s30 = scalar_lea.hbm %s2042_s3, 64 }
   0x6   :  { %p1746_p0 = scmp.ne.s32.totalorder %s2042_s3, %s1745_s30  ;;  %p1749_p1 = scmp.lt.u32.totalorder %s1745_s30, %s2042_s3 }
   0x8   :  { %p1751_p2 = pnand %p1749_p1, %p1746_p0 }
   0xa   :  { %1754 = shalt.err (!%p1751_p2)
}
   0xb   :  { %s1755_s12 = scalar_lea.vmem %s37_s25, 64  ;;  %p1760_p4 = scmp.lt.s32.totalorder %s37_s25, %s37_s25 }
   0xc   :  { %p1756_p3 = scmp.ne.s32.totalorder %s37_s25, %s1755_s12  ;;  %p1761_p5 = scmp.lt.s32.totalorder %s1755_s12, %s1755_s12 }
   0xe   :  { %p1762_p6 = por %p1761_p5, %p1760_p4 }
  0x10   :  { %p1763_p7 = pnand %p1762_p6, %p1756_p3 }
  0x12   :  { %1766 = shalt.err (!%p1763_p7)
}
  0x13   :  { %39 = dma.hbm_to_vmem [thread:$0]  %s2042_s3, 64, %s37_s25, [#allocation7]  }
  0x14   :  { %s1767_s17 = scalar_lea.hbm %s2039_s0, 16 }
  0x15   :  { %p1768_p8 = scmp.ne.s32.totalorder %s2039_s0, %s1767_s17  ;;  %p1771_p9 = scmp.lt.u32.totalorder %s1767_s17, %s2039_s0 }
  0x17   :  { %p1773_p10 = pnand %p1771_p9, %p1768_p8 }
  0x19   :  { %1776 = shalt.err (!%p1773_p10)
}
  0x1a   :  { %s1777_s22 = scalar_lea.vmem %s23_s27, 16  ;;  %s1781_s23 = scalar_lea.vmem %s23_s27, 32 }
  0x1b   :  { %p1778_p11 = scmp.ne.s32.totalorder %s23_s27, %s1777_s22  ;;  %p1782_p12 = scmp.lt.s32.totalorder %s23_s27, %s23_s27 }
  0x1c   :  { %p1783_p13 = scmp.lt.s32.totalorder %s1781_s23, %s1777_s22 }
  0x1e   :  { %p1784_p0 = por %p1783_p13, %p1782_p12 }
  0x20   :  { %p1785_p1 = pnand %p1784_p0, %p1778_p11 }
  0x22   :  { %1788 = shalt.err (!%p1785_p1)
}
  0x23   :  { %25 = dma.hbm_to_vmem [thread:$0]  %s2039_s0, 16, %s23_s27, [#allocation4]  }
  0x24   :  { %s1865_s25 = smov [#allocation8]   ;;  %s1789_s30 = scalar_lea.hbm %s2043_s4, 3072 }
  0x25   :  { %s45_s26 = sshll.u32 %s1865_s25, 4  ;;  %p1790_p2 = scmp.ne.s32.totalorder %s2043_s4, %s1789_s30  ;;  %s46_s26 = int_to_ptr.vmem [resolvable:$true] %s45_s26 }
  0x26   :  { %p1793_p3 = scmp.lt.u32.totalorder %s1789_s30, %s2043_s4 }
  0x28   :  { %p1795_p4 = pnand %p1793_p3, %p1790_p2 }
  0x2a   :  { %1798 = shalt.err (!%p1795_p4)
}
  0x2b   :  { %s1799_s12 = scalar_lea.vmem %s46_s26, 3072  ;;  %p1804_p6 = scmp.lt.s32.totalorder %s46_s26, %s46_s26 }
  0x2c   :  { %p1800_p5 = scmp.ne.s32.totalorder %s46_s26, %s1799_s12  ;;  %p1805_p7 = scmp.lt.s32.totalorder %s1799_s12, %s1799_s12 }
  0x2e   :  { %p1806_p8 = por %p1805_p7, %p1804_p6 }
  0x30   :  { %p1807_p9 = pnand %p1806_p8, %p1800_p5 }
  0x32   :  { %1810 = shalt.err (!%p1807_p9)
}
  0x33   :  { %s1866_s0 = smov 512   ;;  %s1867_s27 = smov 32  }
  0x34   :  { %51 = dma.hbm_to_vmem [thread:$0]  %s2043_s4, 3072, %s46_s26, [#allocation7], %s1866_s0, %s1866_s0, %s1867_s27  }
  0x35   :  { %s1868_s15 = smov [#allocation9]   ;;  %s1811_s19 = scalar_lea.hbm %s2044_s5, 9728 }
  0x36   :  { %s57_s16 = sshll.u32 %s1868_s15, 4  ;;  %p1812_p10 = scmp.ne.s32.totalorder %s2044_s5, %s1811_s19  ;;  %s58_s16 = int_to_ptr.vmem [resolvable:$true] %s57_s16 }
  0x37   :  { %p1815_p11 = scmp.lt.u32.totalorder %s1811_s19, %s2044_s5 }
  0x39   :  { %p1817_p12 = pnand %p1815_p11, %p1812_p10 }
  0x3b   :  { %1820 = shalt.err (!%p1817_p12)
}
  0x3c   :  { %s1821_s3 = scalar_lea.vmem %s58_s16, 9728  ;;  %p1826_p0 = scmp.lt.s32.totalorder %s58_s16, %s58_s16 }
  0x3d   :  { %p1822_p13 = scmp.ne.s32.totalorder %s58_s16, %s1821_s3  ;;  %p1827_p1 = scmp.lt.s32.totalorder %s1821_s3, %s1821_s3 }
  0x3f   :  { %p1828_p2 = por %p1827_p1, %p1826_p0 }
  0x41   :  { %p1829_p3 = pnand %p1828_p2, %p1822_p13 }
  0x43   :  { %1832 = shalt.err (!%p1829_p3)
}
  0x44   :  { %s1869_s4 = smov 64   ;;  %s1870_s24 = smov 4  }
  0x45   :  { %63 = dma.hbm_to_vmem [thread:$0]  %s2044_s5, 9728, %s58_s16, [#allocation10], %s1869_s4, %s1869_s4, %s1870_s24  }
  0x46   :  { %1855 = dma.done.wait [#allocation4], 16  }
  0x47   :  { %1856 = vsyncadd [#allocation4], 4294967280 }
  0x48   :  { %1857 = dma.done.wait [#allocation7], 3136  }
  0x49   :  { %1858 = vsyncadd [#allocation7], 4294964160 }
  0x4a   :  { %1859 = dma.done.wait [#allocation10], 9728  }
  0x4b   :  { %1860 = vsyncadd [#allocation10], 4294957568  ;;  %v1871_v0 = vmov 0.0   ;;  %vm1872_vm0 = vmmov 0   ;;  %v1669_v1 = vld [vmem:[#allocation9] sm:$0xff]   ;;  %v1670_v2 = vld [vmem:[#allocation9 + $0x8] sm:$0xff]  }
  0x4c   :  { %1613 = vmatprep.subr.bf16.mxu0 %v1871_v0  ;;  %1621 = vmatprep.mubr.msk.bf16.mxu0 %vm1872_vm0, %v1871_v0  ;;  %v1671_v3 = vld [vmem:[#allocation9 + $0x10] sm:$0xff]   ;;  %vm117_vm1 = vcmask 523264   ;;  %v1672_v4 = vld [vmem:[#allocation9 + $0x18] sm:$0xff]   ;;  %v363_v6 = vld [vmem:[#allocation8] sm:$0xff]  ;;  %v1873_v12 = vmov 0   ;;  %vm507_vm2 = vcmask 392192  }
  0x4d   :  { %1625 = vmatprep.subr.bf16.mxu1 %v1871_v0  ;;  %1627 = vmatprep.mubr.msk.bf16.mxu1 %vm1872_vm0, %v1871_v0  ;;  %v92_v5 = vld [vmem:[#allocation6] sm:$0xf]  ;;  %v367_v7 = vld [vmem:[#allocation8 + $0x20] sm:$0xff]  ;;  %v1973_v19 = vld [vmem:[#allocation3] sm:$0x1]  ;;  %vm171_vm3 = vcmask 1043456  }
  0x4e   :  { %1614 = vmatpush3.bf16.msra.mxu0 %v1669_v1  ;;  %v371_v8 = vld [vmem:[#allocation8 + $0x40] sm:$0xff]  ;;  %v1405_v9 = vcombine.low %v363_v6, %v367_v7  ;;  %v1406_v10 = vcombine.high %v363_v6, %v367_v7  ;;  %v365_v20 = vld [vmem:[#allocation8 + $0x10] sm:$0xff]  ;;  %vm167_vm4 = vcmask 64512   ;;  %v364_v39 = vld [vmem:[#allocation8 + $0x8] sm:$0xff]  ;;  %s1874_s10 = smov [#allocation11]  }
  0x4f   :  { %1615 = vmatprep.subr.bf16.mxu0 %v1871_v0  ;;  %v375_v11 = vld [vmem:[#allocation8 + $0x60] sm:$0xff]  ;;  %v369_v21 = vld [vmem:[#allocation8 + $0x30] sm:$0xff]  ;;  %v368_v40 = vld [vmem:[#allocation8 + $0x28] sm:$0xff]  ;;  %s1387_s11 = sshll.u32 %s1874_s10, 4  ;;  %s1388_s11 = int_to_ptr.vmem [resolvable:$true] %s1387_s11 }
  0x50   :  { %v1414_v13 = vcombine.high %v371_v8, %v375_v11  ;;  %v379_v14 = vld [vmem:[#allocation8 + $0x80] sm:$0xff]  ;;  %v1413_v16 = vcombine.low %v371_v8, %v375_v11  ;;  %v1410_v25 = vcombine.high %v365_v20, %v369_v21  ;;  %v373_v27 = vld [vmem:[#allocation8 + $0x50] sm:$0xff]  ;;  %v1409_v32 = vcombine.low %v365_v20, %v369_v21  ;;  %v372_v41 = vld [vmem:[#allocation8 + $0x48] sm:$0xff]  ;;  %s1833_s12 = scalar_lea.vmem %s1388_s11, 32  ;;  %p1838_p5 = scmp.lt.s32.totalorder %s1388_s11, %s1388_s11 }
  0x51   :  { %v383_v15 = vld [vmem:[#allocation8 + $0xa0] sm:$0xff]  ;;  %v377_v28 = vld [vmem:[#allocation8 + $0x70] sm:$0xff]  ;;  %v1407_v42 = vcombine.low %v364_v39, %v368_v40  ;;  %v1408_v43 = vcombine.high %v364_v39, %v368_v40  ;;  %v376_v44 = vld [vmem:[#allocation8 + $0x68] sm:$0xff]  ;;  %p1834_p4 = scmp.ne.s32.totalorder %s1388_s11, %s1833_s12  ;;  %p1839_p6 = scmp.lt.s32.totalorder %s1833_s12, %s1833_s12 }
  0x52   :  { %1616 = vmatpush3.bf16.msra.mxu0 %v1670_v2  ;;  %v1422_v17 = vcombine.high %v379_v14, %v383_v15  ;;  %v1421_v18 = vcombine.low %v379_v14, %v383_v15  ;;  %v161_v31 = vld [vmem:[%s2041_s2] sm:$0xf]  ;;  %v1418_v33 = vcombine.high %v373_v27, %v377_v28  ;;  %v381_v34 = vld [vmem:[#allocation8 + $0x90] sm:$0xff]  ;;  %v1417_v36 = vcombine.low %v373_v27, %v377_v28  ;;  %v380_v46 = vld [vmem:[#allocation8 + $0x88] sm:$0xff] }
  0x53   :  { %1617 = vmatprep.subr.bf16.mxu0 %v1871_v0  ;;  %v385_v35 = vld [vmem:[#allocation8 + $0xb0] sm:$0xff]  ;;  %v1416_v45 = vcombine.high %v372_v41, %v376_v44  ;;  %v384_v47 = vld [vmem:[#allocation8 + $0xa8] sm:$0xff]  ;;  %v1415_v48 = vcombine.low %v372_v41, %v376_v44  ;;  %v366_v52 = vld [vmem:[#allocation8 + $0x18] sm:$0xff]  ;;  %p1840_p7 = por %p1839_p6, %p1838_p5 }
  0x54   :  { %v1426_v37 = vcombine.high %v381_v34, %v385_v35  ;;  %v1425_v38 = vcombine.low %v381_v34, %v385_v35  ;;  %v1424_v50 = vcombine.high %v380_v46, %v384_v47  ;;  %v370_v53 = vld [vmem:[#allocation8 + $0x38] sm:$0xff]  ;;  %v1423_v56 = vcombine.low %v380_v46, %v384_v47  ;;  %v1674_v6 = vld [vmem:[#allocation9 + $0x60] sm:$0xff]   ;;  %v1675_v8 = vld [vmem:[#allocation9 + $0xa8] sm:$0xff]  }
  0x55   :  { %v1412_v57 = vcombine.high %v366_v52, %v370_v53  ;;  %v374_v58 = vld [vmem:[#allocation8 + $0x58] sm:$0xff]  ;;  %v1411_v60 = vcombine.low %v366_v52, %v370_v53  ;;  %v1678_v11 = vld [vmem:[#allocation9 + $0x70] sm:$0xff]   ;;  %v1681_v14 = vld [vmem:[#allocation9 + $0xc0] sm:$0xff]   ;;  %p1841_p8 = pnand %p1840_p7, %p1834_p4 }
  0x56   :  { %1618 = vmatpush3.bf16.msra.mxu0 %v1671_v3  ;;  %v378_v59 = vld [vmem:[#allocation8 + $0x78] sm:$0xff]  ;;  %v1682_v15 = vld [vmem:[#allocation9 + $0x80] sm:$0xff]   ;;  %v1693_v27 = vld [vmem:[#allocation9 + $0x168] sm:$0xff]  }
  0x57   :  { %1619 = vmatprep.subr.bf16.mxu0 %v1871_v0  ;;  %v1420_v61 = vcombine.high %v374_v58, %v378_v59  ;;  %v382_v62 = vld [vmem:[#allocation8 + $0x98] sm:$0xff]  ;;  %v1419_v1 = vcombine.low %v374_v58, %v378_v59  ;;  %v1695_v28 = vld [vmem:[#allocation9 + $0x1b0] sm:$0xff]   ;;  %v1704_v34 = vld [vmem:[#allocation9 + $0x1c8] sm:$0xff]  }
  0x58   :  { %v386_v63 = vld [vmem:[#allocation8 + $0xb8] sm:$0xff]  ;;  %v1705_v35 = vld [vmem:[#allocation9 + $0x188] sm:$0xff]   ;;  %v1403_v40 = vld [vmem:[%s2045_s6] ss:$0 sm:$0xff] }
  0x59   :  { %v1428_v2 = vcombine.high %v382_v62, %v386_v63  ;;  %v1427_v3 = vcombine.low %v382_v62, %v386_v63  ;;  %v1687_v20 = vld [vmem:[#allocation9 + $0xd8] sm:$0xff]   ;;  %v1697_v59 = vld [vmem:[#allocation9 + $0x30] sm:$0xff]   ;;  %v1703_v62 = vld [vmem:[#allocation9 + $0x40] sm:$0xff]  }
  0x5a   :  { %1620 = vmatpush3.bf16.msra.mxu0 %v1672_v4  ;;  %v1711_v39 = vld [vmem:[#allocation9 + $0x198] sm:$0xff]   ;;  %v1706_v63 = vld [vmem:[#allocation9 + $0x48] sm:$0xff]  }
  0x5b   :  { %511 = vmatprep.subr.bf16.mxu0 %v1406_v10  ;;  %v1677_v10 = vld [vmem:[#allocation9 + $0xb0] sm:$0xff]  }
  0x5d   :  { %1622 = vmatmul.mubr.msk.bf16.vlgmr.msra.gmra.mrb[0].mxu0 %vm117_vm1, %v92_v5  ;;  %v1673_v5 = vld [vmem:[#allocation9 + $0xa0] sm:$0xff]  }
  0x5e   :  { %543 = vmatprep.mubr.bf16.mxu0 %v1873_v12  ;;  %512 = vmatpush1.bf16.msra.mxu0 %v1405_v9  ;;  %v1676_v9 = vld [vmem:[#allocation9 + $0x68] sm:$0xff]  }
  0x5f   :  { %513 = vmatprep.subr.bf16.mxu0 %v1414_v13  ;;  %v1680_v13 = vld [vmem:[#allocation9 + $0x78] sm:$0xff]  }
  0x62   :  { %514 = vmatpush1.bf16.msra.mxu0 %v1413_v16  ;;  %v1683_v16 = vld [vmem:[#allocation9 + $0xc8] sm:$0xff]  }
  0x63   :  { %515 = vmatprep.subr.bf16.mxu0 %v1422_v17  ;;  %v1684_v17 = vld [vmem:[#allocation9 + $0x88] sm:$0xff]  }
  0x66   :  { %516 = vmatpush1.bf16.msra.mxu0 %v1421_v18  ;;  %v1685_v18 = vld [vmem:[#allocation9 + $0xd0] sm:$0xff]  }
  0x67   :  { %552 = vmatprep.subr.bf16.mxu0 %v1408_v43 }
  0x69   :  { %1429 = vmatmul.mubr.msk.bf16.vlgmr.msra.gmra.mrb[4].mxu0 %vm507_vm2, %v1973_v19 }
  0x6a   :  { %584 = vmatprep.mubr.bf16.mxu0 %v1873_v12  ;;  %553 = vmatpush1.bf16.msra.mxu0 %v1407_v42 }
  0x6b   :  { %554 = vmatprep.subr.bf16.mxu0 %v1416_v45 }
  0x6e   :  { %555 = vmatpush1.bf16.msra.mxu0 %v1415_v48 }
  0x6f   :  { %556 = vmatprep.subr.bf16.mxu0 %v1424_v50  ;;  %v1691_v50 = vld [vmem:[#allocation9 + $0x20] sm:$0xff]  }
  0x72   :  { %557 = vmatpush1.bf16.msra.mxu0 %v1423_v56 }
  0x73   :  { %634 = vmatprep.subr.bf16.mxu0 %v1412_v57 }
  0x75   :  { %1430 = vmatmul.mubr.msk.bf16.vlgmr.msra.gmra.mrb[8].mxu0 %vm507_vm2, %v1973_v19 }
  0x76   :  { %635 = vmatpush1.bf16.msra.mxu0 %v1411_v60  ;;  %666 = vmatprep.mubr.bf16.mxu0 %v1873_v12 }
  0x77   :  { %636 = vmatprep.subr.bf16.mxu0 %v1420_v61  ;;  %v1700_v61 = vld [vmem:[#allocation9 + $0x38] sm:$0xff]  }
  0x7a   :  { %637 = vmatpush1.bf16.msra.mxu0 %v1419_v1  ;;  %v1709_v1 = vld [vmem:[#allocation9 + $0x50] sm:$0xff]  }
  0x7b   :  { %638 = vmatprep.subr.bf16.mxu0 %v1428_v2  ;;  %v1712_v2 = vld [vmem:[#allocation9 + $0x58] sm:$0xff]  }
  0x7e   :  { %639 = vmatpush1.bf16.msra.mxu0 %v1427_v3  ;;  %v1713_v3 = vld [vmem:[#allocation9 + $0x120] sm:$0xff]  }
  0x7f   :  { %1525 = vmatprep.subr.bf16.mxu0 %v1673_v5 }
  0x81   :  { %1432 = vmatmul.mubr.msk.bf16.vlgmr.msra.gmra.mrb[12].mxu0 %vm507_vm2, %v1973_v19 }
  0x82   :  { %1526 = vmatpush3.bf16.msra.mxu0 %v1674_v6 }
  0x83   :  { %1527 = vmatprep.subr.bf16.mxu0 %v1675_v8 }
  0x86   :  { %1528 = vmatpush3.bf16.msra.mxu0 %v1676_v9 }
  0x87   :  { %1529 = vmatprep.subr.bf16.mxu0 %v1677_v10 }
  0x8a   :  { %1530 = vmatpush3.bf16.msra.mxu0 %v1678_v11 }
 0x130   :  { %v155_v22 = vpop.f32.mrb[0].mxu0 }
 0x131   :  { %v162_v23 = vpack.c.bf16 %v155_v22, %v155_v22  ;;  %v1623_v24 = vpop.f32.mrb[1].mxu0  ;;  %v1688_v22 = vld [vmem:[#allocation9 + $0x98] sm:$0xff]  }
 0x132   :  { %v158_v26 = vpop.f32.mrb[2].mxu0 }
 0x133   :  { %v1624_v29 = vpop.f32.mrb[3].mxu0  ;;  %v173_v30 = vsel %vm171_vm3, %v162_v23, 0  ;;  %v1689_v23 = vld [vmem:[#allocation9 + $0x1a0] sm:$0xff]   ;;  %v1692_v26 = vld [vmem:[#allocation9 + $0x1a8] sm:$0xff]  }
 0x134   :  { %1626 = vmatpush3.bf16.msra.mxu1 %v173_v30  ;;  %v1696_v29 = vld [vmem:[#allocation9 + $0x170] sm:$0xff]   ;;  %v1698_v30 = vld [vmem:[#allocation9 + $0x1b8] sm:$0xff]  }
 0x135   :  { %593 = vmatprep.subr.bf16.mxu1 %v1410_v25  ;;  %v1690_v25 = vld [vmem:[#allocation9 + $0x160] sm:$0xff]  }
 0x137   :  { %1628 = vmatmul.mubr.msk.bf16.vlgmr.msra.gmra.mrb[0].mxu1 %vm167_vm4, %v161_v31  ;;  %v1699_v31 = vld [vmem:[#allocation9 + $0x178] sm:$0xff]  }
 0x138   :  { %594 = vmatpush1.bf16.msra.mxu1 %v1409_v32  ;;  %625 = vmatprep.mubr.bf16.mxu1 %v1873_v12  ;;  %v1679_v12 = vld [vmem:[#allocation9 + $0xb8] sm:$0xff]   ;;  %v1701_v32 = vld [vmem:[#allocation9 + $0x1c0] sm:$0xff]  }
 0x139   :  { %595 = vmatprep.subr.bf16.mxu1 %v1418_v33  ;;  %1531 = vmatprep.subr.bf16.mxu0 %v1679_v12  ;;  %v1702_v33 = vld [vmem:[#allocation9 + $0x180] sm:$0xff]  }
 0x13a   :  { %1532 = vmatpush3.bf16.msra.mxu0 %v1680_v13 }
 0x13b   :  { %1533 = vmatprep.subr.bf16.mxu0 %v1681_v14 }
 0x13c   :  { %596 = vmatpush1.bf16.msra.mxu1 %v1417_v36  ;;  %v1989_v49 = vpop.f32.mrb[4].mxu0  ;;  %v1707_v36 = vld [vmem:[#allocation9 + $0x1d0] sm:$0xff]  }
 0x13d   :  { %597 = vmatprep.subr.bf16.mxu1 %v1426_v37  ;;  %v547_v51 = vpop.f32.mrb[5].mxu0  ;;  %v675_v21 = vmax.f32 %v1989_v49, 0.0  ;;  %v1708_v37 = vld [vmem:[#allocation9 + $0x190] sm:$0xff]   ;;  %v691_v49 = vld [vmem:[%s2040_s1] sm:$0x1] }
 0x13e   :  { %v549_v54 = vpop.f32.mrb[6].mxu0  ;;  %v676_v4 = vmax.f32 %v547_v51, 0.0  ;;  %1534 = vmatpush3.bf16.msra.mxu0 %v1682_v15  ;;  %v1694_v51 = vld [vmem:[#allocation9 + $0x28] sm:$0xff]  }
 0x13f   :  { %v550_v55 = vpop.f32.mrb[7].mxu0  ;;  %1535 = vmatprep.subr.bf16.mxu0 %v1683_v16  ;;  %v683_v24 = vpack.c.bf16 %v675_v21, %v675_v21 }
 0x140   :  { %598 = vmatpush1.bf16.msra.mxu1 %v1425_v38  ;;  %v684_v7 = vpack.c.bf16 %v676_v4, %v676_v4  ;;  %v1710_v38 = vld [vmem:[#allocation9 + $0x1d8] sm:$0xff]  }
 0x141   :  { %1631 = vmatprep.subr.bf16.mxu1 %v1871_v0 }
 0x142   :  { %1247 = vmatprep.mubr.bf16.mxu0 %v684_v7  ;;  %1536 = vmatpush3.bf16.msra.mxu0 %v1684_v17 }
 0x143   :  { %1431 = vmatmul.mubr.msk.bf16.vlgmr.msra.gmra.mrb[4].mxu1 %vm507_vm2, %v1973_v19  ;;  %v1686_v19 = vld [vmem:[#allocation9 + $0x90] sm:$0xff]   ;;  %1537 = vmatprep.subr.bf16.mxu0 %v1685_v18  ;;  %v1714_v18 = vld [vmem:[#allocation9 + $0xe0] sm:$0xff]  }
 0x144   :  { %1633 = vmatprep.mubr.msk.bf16.mxu1 %vm1872_vm0, %v1871_v0 }
 0x146   :  { %1538 = vmatpush3.bf16.msra.mxu0 %v1686_v19 }
 0x147   :  { %1539 = vmatprep.subr.bf16.mxu0 %v1687_v20 }
 0x148   :  { %v586_v4 = vpop.f32.mrb[8].mxu0 }
 0x149   :  { %v588_v5 = vpop.f32.mrb[9].mxu0 }
 0x14a   :  { %1540 = vmatpush3.bf16.msra.mxu0 %v1688_v22  ;;  %v590_v6 = vpop.f32.mrb[10].mxu0  ;;  %v678_v17 = vmax.f32 %v588_v5, 0.0  ;;  %v1715_v22 = vld [vmem:[#allocation9 + $0x128] sm:$0xff]  }
 0x14b   :  { %1569 = vmatprep.subr.bf16.mxu0 %v1689_v23  ;;  %v591_v7 = vpop.f32.mrb[11].mxu0 }
 0x14c   :  { %v686_v19 = vpack.c.bf16 %v678_v17, %v678_v17 }
 0x14d   :  { %1248 = vmatmul.mubr.bf16.vlgmr.msra.gmra.mrb[16].mxu0 %v683_v24 }
 0x14e   :  { %1570 = vmatpush3.bf16.msra.mxu0 %v1690_v25  ;;  %v1716_v25 = vld [vmem:[#allocation9 + $0xe8] sm:$0xff]  }
 0x14f   :  { %1571 = vmatprep.subr.bf16.mxu0 %v1692_v26  ;;  %v1717_v26 = vld [vmem:[#allocation9 + $0x130] sm:$0xff]  }
 0x152   :  { %1572 = vmatpush3.bf16.msra.mxu0 %v1693_v27  ;;  %v1718_v27 = vld [vmem:[#allocation9 + $0xf0] sm:$0xff]  }
 0x153   :  { %1573 = vmatprep.subr.bf16.mxu0 %v1695_v28 }
 0x154   :  { %v2015_v8 = vpop.f32.mrb[12].mxu0 }
 0x155   :  { %v670_v9 = vpop.f32.mrb[13].mxu0 }
 0x156   :  { %1574 = vmatpush3.bf16.msra.mxu0 %v1696_v29  ;;  %v672_v10 = vpop.f32.mrb[14].mxu0  ;;  %v1719_v29 = vld [vmem:[#allocation9 + $0x138] sm:$0xff]  }
 0x157   :  { %1575 = vmatprep.subr.bf16.mxu0 %v1698_v30  ;;  %v673_v11 = vpop.f32.mrb[15].mxu0 }
 0x15a   :  { %1576 = vmatpush3.bf16.msra.mxu0 %v1699_v31 }
 0x15b   :  { %1577 = vmatprep.subr.bf16.mxu0 %v1701_v32 }
 0x15e   :  { %1578 = vmatpush3.bf16.msra.mxu0 %v1702_v33 }
 0x15f   :  { %1579 = vmatprep.subr.bf16.mxu0 %v1704_v34  ;;  %v1720_v34 = vld [vmem:[#allocation9 + $0xf8] sm:$0xff]  }
 0x162   :  { %1580 = vmatpush3.bf16.msra.mxu0 %v1705_v35  ;;  %v1721_v35 = vld [vmem:[#allocation9 + $0x140] sm:$0xff]  }
 0x163   :  { %1581 = vmatprep.subr.bf16.mxu0 %v1707_v36  ;;  %v1722_v36 = vld [vmem:[#allocation9 + $0x100] sm:$0xff]  }
 0x166   :  { %1582 = vmatpush3.bf16.msra.mxu0 %v1708_v37  ;;  %v1723_v37 = vld [vmem:[#allocation9 + $0x148] sm:$0xff]  }
 0x167   :  { %1583 = vmatprep.subr.bf16.mxu0 %v1710_v38  ;;  %v1724_v38 = vld [vmem:[#allocation9 + $0x108] sm:$0xff]  }
 0x16a   :  { %1584 = vmatpush3.bf16.msra.mxu0 %v1711_v39  ;;  %v1725_v39 = vld [vmem:[#allocation9 + $0x150] sm:$0xff]  }
 0x20a   :  { %v209_v41 = vpop.f32.mrb[0].mxu1 }
 0x20b   :  { %v210_v42 = vadd.f32 %v1403_v40, %v209_v41  ;;  %v1629_v43 = vpop.f32.mrb[1].mxu1  ;;  %v1726_v40 = vld [vmem:[#allocation9 + $0x110] sm:$0xff]   ;;  %v1727_v41 = vld [vmem:[#allocation9 + $0x158] sm:$0xff]  }
 0x20c   :  { %v212_v44 = vpop.f32.mrb[2].mxu1  ;;  %v1728_v43 = vld [vmem:[#allocation9 + $0x118] sm:$0xff]  }
 0x20d   :  { %v215_v45 = vmax.f32 %v210_v42, 0.0  ;;  %v1630_v46 = vpop.f32.mrb[3].mxu1  ;;  %v677_v42 = vmax.f32 %v586_v4, 0.0  ;;  %v682_v44 = vmax.f32 %v670_v9, 0.0 }
 0x20f   :  { %v693_v47 = vpack.c.bf16 %v215_v45, %v215_v45  ;;  %v1729_v45 = vld [vmem:[#allocation9 + $0x220] sm:$0xff]   ;;  %v685_v46 = vpack.c.bf16 %v677_v42, %v677_v42 }
 0x211   :  { %v700_v48 = vsel %vm171_vm3, %v693_v47, 0  ;;  %v1730_v47 = vld [vmem:[#allocation9 + $0x1e0] sm:$0xff]  }
 0x212   :  { %1632 = vmatpush3.bf16.msra.mxu1 %v700_v48  ;;  %v690_v48 = vpack.c.bf16 %v682_v44, %v682_v44 }
 0x213   :  { %1637 = vmatprep.subr.bf16.mxu1 %v1871_v0 }
 0x215   :  { %1634 = vmatmul.mubr.msk.bf16.vlgmr.msra.gmra.mrb[8].mxu1 %vm167_vm4, %v691_v49  ;;  %v1731_v49 = vld [vmem:[#allocation9 + $0x228] sm:$0xff]  }
 0x216   :  { %1638 = vmatpush3.bf16.msra.mxu1 %v1691_v50  ;;  %v627_v52 = vpop.f32.mrb[4].mxu1  ;;  %1653 = vmatprep.mubr.msk.bf16.mxu1 %vm1872_vm0, %v1871_v0  ;;  %v1732_v50 = vld [vmem:[#allocation9 + $0x1e8] sm:$0xff]  }
 0x217   :  { %1639 = vmatprep.subr.bf16.mxu1 %v1871_v0  ;;  %v679_v53 = vmax.f32 %v627_v52, 0.0  ;;  %v629_v54 = vpop.f32.mrb[5].mxu1  ;;  %v1734_v52 = vld [vmem:[#allocation9 + $0x1f0] sm:$0xff]  }
 0x218   :  { %v680_v55 = vmax.f32 %v629_v54, 0.0  ;;  %v631_v56 = vpop.f32.mrb[6].mxu1  ;;  %v1736_v54 = vld [vmem:[#allocation9 + $0x1f8] sm:$0xff]  }
 0x219   :  { %v687_v57 = vpack.c.bf16 %v679_v53, %v679_v53  ;;  %v632_v58 = vpop.f32.mrb[7].mxu1  ;;  %v1735_v53 = vld [vmem:[#allocation9 + $0x238] sm:$0xff]   ;;  %v1738_v56 = vld [vmem:[#allocation9 + $0x200] sm:$0xff]  }
 0x21a   :  { %1640 = vmatpush3.bf16.msra.mxu1 %v1694_v51  ;;  %v688_v60 = vpack.c.bf16 %v680_v55, %v680_v55  ;;  %v1733_v51 = vld [vmem:[#allocation9 + $0x230] sm:$0xff]   ;;  %v1737_v55 = vld [vmem:[#allocation9 + $0x240] sm:$0xff]   ;;  %v1740_v58 = vld [vmem:[#allocation9 + $0x208] sm:$0xff]  }
 0x21b   :  { %1641 = vmatprep.subr.bf16.mxu1 %v1871_v0 }
 0x21c   :  { %1327 = vmatprep.mubr.bf16.mxu0 %v688_v60  ;;  %v1742_v60 = vld [vmem:[#allocation9 + $0x210] sm:$0xff]  }
 0x21d   :  { %1328 = vmatmul.mubr.bf16.vlgmr.msra.gmra.mrb[20].mxu0 %v687_v57  ;;  %v1739_v57 = vld [vmem:[#allocation9 + $0x248] sm:$0xff]  }
 0x21e   :  { %1642 = vmatpush3.bf16.msra.mxu1 %v1697_v59  ;;  %v1741_v59 = vld [vmem:[#allocation9 + $0x250] sm:$0xff]  }
 0x21f   :  { %1643 = vmatprep.subr.bf16.mxu1 %v1871_v0 }
 0x220   :  { %v1541_v12 = vpop.f32.mrb[16].mxu0 }
 0x221   :  { %v1542_v13 = vpop.f32.mrb[17].mxu0 }
 0x222   :  { %1644 = vmatpush3.bf16.msra.mxu1 %v1700_v61  ;;  %v2017_v14 = vadd.f32 %v1542_v13, %v1541_v12  ;;  %v1544_v15 = vpop.f32.mrb[18].mxu0  ;;  %v1743_v61 = vld [vmem:[#allocation9 + $0x258] sm:$0xff]  }
 0x223   :  { %1645 = vmatprep.subr.bf16.mxu1 %v1871_v0  ;;  %v1545_v16 = vpop.f32.mrb[19].mxu0 }
 0x226   :  { %1646 = vmatpush3.bf16.msra.mxu1 %v1703_v62  ;;  %v1744_v62 = vld [vmem:[#allocation9 + $0x218] sm:$0xff]  }
 0x227   :  { %1647 = vmatprep.subr.bf16.mxu1 %v1871_v0 }
 0x22a   :  { %1648 = vmatpush3.bf16.msra.mxu1 %v1706_v63  ;;  %v681_v63 = vmax.f32 %v2015_v8, 0.0 }
 0x22b   :  { %1649 = vmatprep.subr.bf16.mxu1 %v1871_v0 }
 0x22e   :  { %1650 = vmatpush3.bf16.msra.mxu1 %v1709_v1  ;;  %v689_v1 = vpack.c.bf16 %v681_v63, %v681_v63 }
 0x22f   :  { %1651 = vmatprep.subr.bf16.mxu1 %v1871_v0 }
 0x232   :  { %1652 = vmatpush3.bf16.msra.mxu1 %v1712_v2 }
 0x233   :  { %1547 = vmatprep.subr.bf16.mxu1 %v1713_v3 }
 0x2e8   :  { %v736_v0 = vpop.f32.mrb[8].mxu1 }
 0x2e9   :  { %v742_v20 = vpack.c.bf16 %v736_v0, %v736_v0  ;;  %v1635_v21 = vpop.f32.mrb[9].mxu1 }
 0x2ea   :  { %v739_v23 = vpop.f32.mrb[10].mxu1 }
 0x2eb   :  { %1654 = vmatmul.mubr.bf16.vlgmr.msra.gmra.mrb[12].mxu1 %v742_v20  ;;  %v1636_v24 = vpop.f32.mrb[11].mxu1 }
 0x2ec   :  { %1548 = vmatpush3.bf16.msra.mxu1 %v1714_v18  ;;  %1287 = vmatprep.mubr.bf16.mxu1 %v686_v19 }
 0x2ed   :  { %1549 = vmatprep.subr.bf16.mxu1 %v1715_v22 }
 0x2f0   :  { %1550 = vmatpush3.bf16.msra.mxu1 %v1716_v25  ;;  %v1585_v28 = vpop.f32.mrb[20].mxu0 }
 0x2f1   :  { %1551 = vmatprep.subr.bf16.mxu1 %v1717_v26  ;;  %v1586_v30 = vpop.f32.mrb[21].mxu0 }
 0x2f2   :  { %v2019_v31 = vadd.f32 %v1586_v30, %v1585_v28  ;;  %v1588_v32 = vpop.f32.mrb[22].mxu0 }
 0x2f3   :  { %v1589_v33 = vpop.f32.mrb[23].mxu0 }
 0x2f4   :  { %1552 = vmatpush3.bf16.msra.mxu1 %v1718_v27 }
 0x2f5   :  { %1553 = vmatprep.subr.bf16.mxu1 %v1719_v29 }
 0x2f8   :  { %1554 = vmatpush3.bf16.msra.mxu1 %v1720_v34 }
 0x2f9   :  { %1555 = vmatprep.subr.bf16.mxu1 %v1721_v35 }
 0x2fc   :  { %1556 = vmatpush3.bf16.msra.mxu1 %v1722_v36 }
 0x2fd   :  { %1557 = vmatprep.subr.bf16.mxu1 %v1723_v37 }
 0x300   :  { %1558 = vmatpush3.bf16.msra.mxu1 %v1724_v38 }
 0x301   :  { %1559 = vmatprep.subr.bf16.mxu1 %v1725_v39 }
 0x304   :  { %1560 = vmatpush3.bf16.msra.mxu1 %v1726_v40 }
 0x305   :  { %1561 = vmatprep.subr.bf16.mxu1 %v1727_v41 }
 0x308   :  { %1562 = vmatpush3.bf16.msra.mxu1 %v1728_v43 }
 0x309   :  { %1591 = vmatprep.subr.bf16.mxu1 %v1729_v45 }
 0x30b   :  { %1288 = vmatmul.mubr.bf16.vlgmr.msra.gmra.mrb[16].mxu1 %v685_v46 }
 0x30c   :  { %1592 = vmatpush3.bf16.msra.mxu1 %v1730_v47  ;;  %1367 = vmatprep.mubr.bf16.mxu1 %v690_v48 }
 0x30d   :  { %1593 = vmatprep.subr.bf16.mxu1 %v1731_v49 }
 0x310   :  { %1594 = vmatpush3.bf16.msra.mxu1 %v1732_v50 }
 0x311   :  { %1595 = vmatprep.subr.bf16.mxu1 %v1733_v51 }
 0x314   :  { %1596 = vmatpush3.bf16.msra.mxu1 %v1734_v52 }
 0x315   :  { %1597 = vmatprep.subr.bf16.mxu1 %v1735_v53 }
 0x318   :  { %1598 = vmatpush3.bf16.msra.mxu1 %v1736_v54 }
 0x319   :  { %1599 = vmatprep.subr.bf16.mxu1 %v1737_v55 }
 0x31c   :  { %1600 = vmatpush3.bf16.msra.mxu1 %v1738_v56 }
 0x31d   :  { %1601 = vmatprep.subr.bf16.mxu1 %v1739_v57 }
 0x320   :  { %1602 = vmatpush3.bf16.msra.mxu1 %v1740_v58 }
 0x321   :  { %1603 = vmatprep.subr.bf16.mxu1 %v1741_v59 }
 0x324   :  { %1604 = vmatpush3.bf16.msra.mxu1 %v1742_v60 }
 0x325   :  { %1605 = vmatprep.subr.bf16.mxu1 %v1743_v61 }
 0x328   :  { %1606 = vmatpush3.bf16.msra.mxu1 %v1744_v62 }
 0x32b   :  { %1368 = vmatmul.mubr.bf16.vlgmr.msra.gmra.mrb[20].mxu1 %v689_v1 }
 0x3be   :  { %v825_v2 = vpop.f32.mrb[12].mxu1 }
 0x3bf   :  { %v1250_v3 = vadd.f32 %v2017_v14, %v825_v2  ;;  %v1655_v4 = vpop.f32.mrb[13].mxu1  ;;  %v1506_v14 = vld [vmem:[%s2045_s6 + $0x8] ss:$0 sm:$0xff] }
 0x3c0   :  { %v828_v5 = vpop.f32.mrb[14].mxu1 }
 0x3c1   :  { %v1656_v6 = vpop.f32.mrb[15].mxu1 }
 0x3de   :  { %v1563_v7 = vpop.f32.mrb[16].mxu1 }
 0x3df   :  { %v1564_v9 = vpop.f32.mrb[17].mxu1 }
 0x3e0   :  { %v1565_v10 = vadd.f32 %v1564_v9, %v1563_v7  ;;  %v1566_v11 = vpop.f32.mrb[18].mxu1 }
 0x3e1   :  { %v1567_v12 = vpop.f32.mrb[19].mxu1 }
 0x3e2   :  { %v1290_v13 = vadd.f32 %v1565_v10, %v1250_v3 }
 0x3e4   :  { %v1330_v15 = vadd.f32 %v2019_v31, %v1290_v13 }
 0x3fe   :  { %v1607_v16 = vpop.f32.mrb[20].mxu1 }
 0x3ff   :  { %v1608_v8 = vpop.f32.mrb[21].mxu1 }
 0x400   :  { %v1609_v17 = vadd.f32 %v1608_v8, %v1607_v16  ;;  %v1610_v0 = vpop.f32.mrb[22].mxu1 }
 0x401   :  { %v1611_v18 = vpop.f32.mrb[23].mxu1 }
 0x402   :  { %v1370_v19 = vadd.f32 %v1609_v17, %v1330_v15 }
 0x404   :  { %v1379_v20 = vadd.f32 %v1506_v14, %v1370_v19 }
 0x406   :  { %1380 = vst [vmem:[#allocation11] sm:$0x3] %v1379_v20 }
 0x407   :  { %1844 = shalt.err (!%p1841_p8)
}
 0x408   :  { %s1845_s13 = scalar_lea.hbm %s2046_s7, 32 }
 0x409   :  { %p1846_p9 = scmp.ne.s32.totalorder %s2046_s7, %s1845_s13  ;;  %p1849_p10 = scmp.lt.u32.totalorder %s1845_s13, %s2046_s7 }
 0x40b   :  { %p1851_p11 = pnand %p1849_p10, %p1846_p9 }
 0x40d   :  { %1854 = shalt.err (!%p1851_p11)
}
 0x40e   :  { %1390 = dma.vmem_to_hbm [thread:$0]  %s1388_s11, 32, %s2046_s7, [#allocation5]  }
 0x40f   :  { %1861 = dma.done.wait [#allocation5], 32  }
 0x410   :  { %1862 = vsyncadd [#allocation5], 4294967264 }
 0x411   :  { %1394 = vsyncpa [#allocation4], 1 }
 0x412   :  { %1395 = vsyncpa [#allocation7], 1 }
 0x413   :  { %1396 = vsyncpa [#allocation10], 1 }
 0x414   :  { %1397 = vsyncpa [#allocation5], 1 }

</bundles_post_ra>
